<compile_context>
chip_gen: v5e
topology: v5e:2x2
jax: 0.10.0
libtpu: 0.0.40
codegen_flags: <defaults>
</compile_context>

<pallas_src>
import jax
import jax.numpy as jnp
from jax.experimental import pallas as pl
from jax.experimental.pallas import tpu as pltpu


def _round_up(x, m):
    return ((x + m - 1) // m) * m


def _conv_matmul_kernel(w_ref, b_ref, p_ref, o_ref):
    # w_ref: [OC, K]   flattened conv weight (resident across grid)
    # b_ref: [OC, 1]   bias column (resident across grid)
    # p_ref: [K, TM]   im2col patch tile (K on sublanes, M-tile on lanes)
    # o_ref: [OC, TM]  output tile (lane-dense stores)
    acc = jnp.dot(w_ref[...], p_ref[...], preferred_element_type=jnp.float32)
    acc = acc + b_ref[...]                        # broadcast bias over lanes (M)
    neg_slope = jnp.float32(0.01)                 # PyTorch LeakyReLU default
    o_ref[...] = jnp.where(acc >= 0, acc, neg_slope * acc).astype(o_ref.dtype)


def conv_block_forward(x, weight, bias, *, stride=2, padding=1, tile_m=1024):
    """x: [N, C, H, W] (NCHW). weight: [OC, C, KH, KW]. bias: [OC]."""
    N, C, H, W = x.shape
    OC, _, KH, KW = weight.shape
    OH = (H + 2 * padding - KH) // stride + 1
    OW = (W + 2 * padding - KW) // stride + 1
    M = N * OH * OW
    K = C * KH * KW

    # ---- im2col glue (plain JAX), built directly in [K, M] layout ----
    xp = jnp.pad(x, ((0, 0), (0, 0), (padding, padding), (padding, padding)))
    slices = []
    for kh in range(KH):
        for kw in range(KW):
            slices.append(
                xp[:, :, kh:kh + stride * OH:stride, kw:kw + stride * OW:stride]
            )  # each [N, C, OH, OW]
    # [N, C, KH*KW, OH, OW] -> [C, KH*KW, N, OH, OW] -> [K, M]
    # K index = c*KH*KW + kh*KW + kw  (matches weight.reshape(OC, C*KH*KW))
    pat = jnp.stack(slices, axis=2).transpose(1, 2, 0, 3, 4).reshape(K, M)

    # ---- M tiling: lane axis, multiple of 128, padded up to the tile grid ----
    tm = min(tile_m, _round_up(M, 128))
    m_pad = _round_up(M, tm)
    if m_pad != M:
        pat = jnp.pad(pat, ((0, 0), (0, m_pad - M)))

    w_flat = weight.reshape(OC, K)        # [OC, K]
    b_col = bias.reshape(OC, 1)           # [OC, 1]

    grid = (m_pad // tm,)
    out = pl.pallas_call(
        _conv_matmul_kernel,
        out_shape=jax.ShapeDtypeStruct((OC, m_pad), x.dtype),
        grid_spec=pltpu.PrefetchScalarGridSpec(
            num_scalar_prefetch=0,
            grid=grid,
            in_specs=[
                pl.BlockSpec((OC, K), lambda i: (0, 0)),   # weight, resident
                pl.BlockSpec((OC, 1), lambda i: (0, 0)),   # bias, resident
                pl.BlockSpec((K, tm), lambda i: (0, i)),   # patch tile, pipelined
            ],
            out_specs=pl.BlockSpec((OC, tm), lambda i: (0, i)),
        ),
        compiler_params=pltpu.CompilerParams(
            dimension_semantics=("parallel",),             # megacore shard on v7x
        ),
    )(w_flat, b_col, pat)

    # [OC, M] -> [OC, N, OH, OW] -> NCHW
    out = out[:, :M]
    return out.reshape(OC, N, OH, OW).transpose(1, 0, 2, 3)


if __name__ == "__main__":
    key = jax.random.PRNGKey(0)
    k_x, k_w, k_b = jax.random.split(key, 3)

    N, C, H, W = 2, 4, 16, 16
    OC, KH, KW = 8, 3, 3

    x = jax.random.normal(k_x, (N, C, H, W), dtype=jnp.float32)
    # shapes match nn.Conv2d(4, 8, 3, stride=2, padding=1)
    weight = jax.random.normal(k_w, (OC, C, KH, KW), dtype=jnp.float32) * 0.1
    bias = jax.random.normal(k_b, (OC,), dtype=jnp.float32) * 0.1

    out = conv_block_forward(x, weight, bias, stride=2, padding=1)
    out = jax.block_until_ready(out)
    assert out.shape == (N, OC, 8, 8), out.shape

    # correctness check vs. XLA conv reference (f32, highest precision)
    ref = jax.lax.conv_general_dilated(
        x, weight, window_strides=(2, 2), padding=((1, 1), (1, 1)),
        dimension_numbers=("NCHW", "OIHW", "NCHW"),
        precision=jax.lax.Precision.HIGHEST,
    ) + bias.reshape(1, OC, 1, 1)
    ref = jnp.where(ref >= 0, ref, 0.01 * ref)
    assert jnp.allclose(out, ref, atol=2e-3, rtol=2e-3), float(
        jnp.max(jnp.abs(out - ref)))

    print("KERNEL_OK")
</pallas_src>

<mosaic_0001>
module attributes {stable_mosaic.version = 11 : i64} {
  func.func @_conv_matmul_kernel(%arg0: i32, %arg1: memref<8x36xf32, #tpu.memory_space<vmem>>, %arg2: memref<8x1xf32, #tpu.memory_space<vmem>>, %arg3: memref<36x128xf32, #tpu.memory_space<vmem>>, %arg4: memref<8x128xf32, #tpu.memory_space<vmem>>) attributes {dimension_semantics = [#tpu.dimension_semantics<parallel>], iteration_bounds = array<i64: 1>, scalar_prefetch = 0 : i64, scratch_operands = 0 : i64, tpu.core_type = #tpu.core_type<tc>, window_params = [{pipeline_mode = #tpu.pipeline_mode<synchronous>, transform_indices = @transform_0, window_bounds = array<i64: 8, 36>}, {pipeline_mode = #tpu.pipeline_mode<synchronous>, transform_indices = @transform_1, window_bounds = array<i64: 8, 1>}, {transform_indices = @transform_2, window_bounds = array<i64: 36, 128>}, {transform_indices = @transform_3, window_bounds = array<i64: 8, 128>}]} {
    %c0 = arith.constant 0 : index
    %c0_0 = arith.constant 0 : index
    %0 = vector.load %arg1[%c0, %c0_0] : memref<8x36xf32, #tpu.memory_space<vmem>>, vector<8x36xf32>
    %c0_1 = arith.constant 0 : index
    %c0_2 = arith.constant 0 : index
    %1 = vector.load %arg3[%c0_1, %c0_2] : memref<36x128xf32, #tpu.memory_space<vmem>>, vector<36x128xf32>
    %cst = arith.constant dense<0.000000e+00> : vector<8x128xf32>
    %2 = tpu.matmul %0, %1, %cst {dimension_numbers = #tpu.dot_dimension_numbers<[1], [0], [0], [1], [0, 0, 1, 1], [], []>} : vector<8x36xf32>, vector<36x128xf32>, vector<8x128xf32> -> vector<8x128xf32>
    %c0_3 = arith.constant 0 : index
    %c0_4 = arith.constant 0 : index
    %3 = vector.load %arg2[%c0_3, %c0_4] : memref<8x1xf32, #tpu.memory_space<vmem>>, vector<8x1xf32>
    %4 = vector.broadcast %3 : vector<8x1xf32> to vector<8x128xf32>
    %5 = arith.addf %2, %4 : vector<8x128xf32>
    %cst_5 = arith.constant 0.000000e+00 : f32
    %6 = vector.broadcast %cst_5 : f32 to vector<8x128xf32>
    %7 = arith.cmpf oge, %5, %6 : vector<8x128xf32>
    %cst_6 = arith.constant 0.00999999977 : f32
    %8 = vector.broadcast %cst_6 : f32 to vector<8x128xf32>
    %9 = arith.mulf %8, %5 : vector<8x128xf32>
    %10 = arith.select %7, %5, %9 : vector<8x128xi1>, vector<8x128xf32>
    %c0_7 = arith.constant 0 : index
    %c0_8 = arith.constant 0 : index
    %11 = vector.load %arg4[%c0_7, %c0_8] : memref<8x128xf32, #tpu.memory_space<vmem>>, vector<8x128xf32>
    tpu.vector_store %arg4[%c0_7, %c0_8], %10 {strides = array<i32>} : memref<8x128xf32, #tpu.memory_space<vmem>>, vector<8x128xf32>,
    return
  }
  func.func @transform_0(%arg0: i32) -> (i32, i32) {
    %c0_i32 = arith.constant 0 : i32
    %c0_i32_0 = arith.constant 0 : i32
    %c0_i32_1 = arith.constant 0 : i32
    return %c0_i32, %c0_i32_0 : i32, i32
  }
  func.func @transform_1(%arg0: i32) -> (i32, i32) {
    %c0_i32 = arith.constant 0 : i32
    %c0_i32_0 = arith.constant 0 : i32
    %c0_i32_1 = arith.constant 0 : i32
    return %c0_i32, %c0_i32_0 : i32, i32
  }
  func.func @transform_2(%arg0: i32) -> (i32, i32) {
    %c0_i32 = arith.constant 0 : i32
    %c0_i32_0 = arith.constant 0 : i32
    return %c0_i32, %arg0 : i32, i32
  }
  func.func @transform_3(%arg0: i32) -> (i32, i32) {
    %c0_i32 = arith.constant 0 : i32
    %c0_i32_0 = arith.constant 0 : i32
    return %c0_i32, %arg0 : i32, i32
  }
}

</mosaic_0001>

<bundles_post_ra>
// kernel: tpu_custom_call.1
= control target key start
LH: loop header
LB: loop body
LE: loop exit
PB: predicated region body
PF: predicated region fallthrough
CT: control target
= control target key end

     0   :  { %8 = vsyncpa [#allocation3], 0  ;;  %s189_s0 = inlined_call_operand.vmem [shape: f32[8,36], index: 0, kind: input, shape index: {}]   ;;  %s190_s1 = inlined_call_operand.vmem [shape: f32[8,1], index: 1, kind: input, shape index: {}]   ;;  %s191_s2 = inlined_call_operand.hbm [shape: f32[36,128], index: 2, kind: input, shape index: {}]   ;;  %s192_s3 = inlined_call_operand.hbm [shape: f32[8,128], index: 3, kind: output, shape index: {}]  }
   0x1   :  { %9 = vsyncpa [#allocation4], 0  ;;  %s18_s14 = sshll.u32 %s191_s2, 4  ;;  %s152_s15 = smov [#allocation2]   ;;  %s19_s14 = int_to_ptr.hbm [resolvable:$true] %s18_s14 }
   0x2   :  { %s20_s16 = sshll.u32 %s152_s15, 4  ;;  %s153_s17 = smov 128   ;;  %s21_s16 = int_to_ptr.vmem [resolvable:$true] %s20_s16 }
   0x3   :  { %s154_s18 = smov 8  }
   0x4   :  { %26 = dma.hbm_to_vmem [thread:$0]  %s19_s14, 640, %s21_s16, [#allocation3], %s153_s17, %s153_s17, %s154_s18  }
   0x5   :  { %148 = dma.done.wait [#allocation3], 640  }
   0x6   :  { %149 = vsyncadd [#allocation3], 4294966656  ;;  %v155_v0 = vmov 0   ;;  %vm47_vm0 = vcmask 1043456   ;;  %v36_v1 = vld [vmem:[#allocation2 + $0x20] sm:$0xf] }
   0x7   :  { %99 = vset.pattern.permute.xlu0 %v155_v0  ;;  %v35_v2 = vld [vmem:[#allocation2 + $0x18] sm:$0xff]  ;;  %92 = vmatpush.msk.msra.mxu0 %vm47_vm0, %v36_v1  ;;  %v34_v3 = vld [vmem:[#allocation2 + $0x10] sm:$0xff]  ;;  %v37_v4 = vld [vmem:[%s190_s1] sm:$0xff]  ;;  %vm43_vm1 = vcmask 293888   ;;  %s156_s22 = smov [#allocation5]   ;;  %s82_s25 = sshll.u32 %s192_s3, 4  ;;  %s83_s25 = int_to_ptr.hbm [resolvable:$true] %s82_s25 }
   0x8   :  { %40 = vperm.xlu0 %99, %v37_v4   ;;  %v33_v5 = vld [vmem:[#allocation2 + $0x8] sm:$0xff]  ;;  %v32_v6 = vld [vmem:[#allocation2] sm:$0xff]  ;;  %s80_s23 = sshll.u32 %s156_s22, 4  ;;  %s81_s23 = int_to_ptr.vmem [resolvable:$true] %s80_s23 }
   0x9   :  { %63 = vmatpush.msra.mxu0 %v35_v2  ;;  %v31_v7 = vld [vmem:[%s189_s0] sm:$0xff] }
   0xb   :  { %64 = vmatpush.msra.mxu0 %v34_v3 }
   0xd   :  { %65 = vmatpush.msra.mxu0 %v33_v5 }
   0xf   :  { %66 = vmatpush.msra.mxu0 %v32_v6 }
  0x10   :  { %93 = vmatmul.msk.f32.vlgmr.msra.gmra.mxu0 %vm43_vm1, %v31_v7 }
  0x7a   :  { %v41_v8 = vpop.permute.xlu0 %40 }
  0x8d   :  { %v68_v9 = vpop.f32.mrf.mxu0 }
  0x8e   :  { %v69_v10 = vadd.f32 %v68_v9, %v41_v8 }
  0x90   :  { %vm71_vm2 = vcmp.ge.f32.partialorder %v69_v10, 0.0  ;;  %v72_v11 = vmul.f32 0.01, %v69_v10 }
  0x92   :  { %v73_v12 = vsel %vm71_vm2, %v69_v10, %v72_v11 }
  0x93   :  { %74 = vst [vmem:[#allocation5] sm:$0xff] %v73_v12 }
  0x94   :  { %85 = dma.vmem_to_hbm [thread:$0]  %s81_s23, 128, %s83_s25, [#allocation4]  }
  0x95   :  { %150 = dma.done.wait [#allocation4], 128  }
  0x96   :  { %151 = vsyncadd [#allocation4], 4294967168 }
  0x97   :  { %90 = vsyncpa [#allocation3], 1 }
  0x98   :  { %91 = vsyncpa [#allocation4], 1 }

</bundles_post_ra>
